<compile_context>
chip_gen: v7x
topology: tpu7x:2x2x1
jax: 0.10.0
libtpu: 0.0.40
codegen_flags: <defaults>
</compile_context>

<pallas_src>
import functools

import jax
import jax.numpy as jnp
from jax import lax
from jax.experimental import pallas as pl
from jax.experimental.pallas import tpu as pltpu


# ------------------------------ helpers ------------------------------------ #

def _round_up(v, m):
    return ((v + m - 1) // m) * m


def _detect_vmem_capacity():
    """Physical VMEM per TensorCore; conservative fallback (v7x = 64 MiB)."""
    try:
        info = pltpu.get_tpu_info()
        cap = getattr(info, "vmem_capacity_bytes", None)
        if cap:
            return int(cap)
    except Exception:
        pass
    return 64 << 20


def _default_tuning():
    cap = _detect_vmem_capacity()
    if cap >= (96 << 20):        # v5e / v6e: 128 MiB physical VMEM
        return dict(fuse_vmem_bytes=24 << 20, fused_vmem_limit=100 << 20,
                    target_block_bytes=8 << 20, stream_vmem_limit=64 << 20)
    else:                         # v7x: 64 MiB per TensorCore
        return dict(fuse_vmem_bytes=12 << 20, fused_vmem_limit=48 << 20,
                    target_block_bytes=4 << 20, stream_vmem_limit=44 << 20)


def _pick_row_tile(R):
    if R <= 64:
        return R                  # one row block; full dim is always legal
    return 64                     # multiple of 8; ragged tail handled by cdiv


def _pick_tile_s(S, row_tile, target_bytes):
    """Lane-dense tile (multiple of 128, >=512 when possible) under a byte
    budget.  Does NOT need to divide S: the grid uses cdiv and the kernels
    mask / drop the out-of-bounds tail."""
    if S <= 512:
        return S                  # full axis (block dim == array dim is legal)
    per_col = 4 * row_tile        # fp32 bytes per lane column
    max_elems = max(512, target_bytes // per_col)
    tile = max(512, (max_elems // 128) * 128)
    tile = min(tile, (S // 128) * 128)
    return tile


# ----------------------------- Pallas kernels ------------------------------ #

def _fused_bn_relu_kernel(x_ref, gamma_ref, beta_ref, o_ref, *, count, eps):
    """Single pass (whole tensor resident in VMEM): stats + normalize + ReLU.

    Sum / sum-of-squares form: no full-tensor centered temporary; per-channel
    scale/shift computed once, then y = relu(x*scale + shift)."""
    x = x_ref[...].astype(jnp.float32)                       # (N, C, S)
    sum_c = jnp.sum(jnp.sum(x, axis=2, keepdims=True), axis=0, keepdims=True)
    sq_c = jnp.sum(jnp.sum(x * x, axis=2, keepdims=True), axis=0, keepdims=True)
    inv_count = 1.0 / count
    mean = sum_c * inv_count                                 # (1, C, 1)
    var = jnp.maximum(sq_c * inv_count - mean * mean, 0.0)   # biased, clamped
    inv_std = lax.rsqrt(var + eps)
    scale = gamma_ref[...] * inv_std                         # (1, C, 1)
    shift = beta_ref[...] - mean * scale
    o_ref[...] = jnp.maximum(x * scale + shift, 0.0).astype(o_ref.dtype)


def _stats_kernel(x_ref, sum_ref, sq_ref, *, S, tile_s, n_s_inner, mask_tail):
    """Pass 1: per-row (row = (n, c)) partial sum / sum-of-squares over S."""
    s = pl.program_id(2)

    @pl.when(s == 0)
    def _():
        sum_ref[...] = jnp.zeros_like(sum_ref)
        sq_ref[...] = jnp.zeros_like(sq_ref)

    x = x_ref[...].astype(jnp.float32)                       # (row_tile, tile_s)
    if mask_tail:
        h = pl.program_id(1)
        start = (h * n_s_inner + s) * tile_s
        lane = lax.broadcasted_iota(jnp.int32, x.shape, 1)
        x = jnp.where(start + lane < S, x, 0.0)
    sum_ref[...] += jnp.sum(x, axis=1, keepdims=True)
    sq_ref[...] += jnp.sum(x * x, axis=1, keepdims=True)


def _apply_kernel(x_ref, scale_ref, shift_ref, o_ref):
    """Pass 2: y = relu(x * scale + shift) with precomputed per-row terms.
    Out-of-bounds lanes/rows of boundary blocks are dropped on write."""
    x = x_ref[...].astype(jnp.float32)                       # (row_tile, tile_s)
    y = x * scale_ref[...] + shift_ref[...]
    o_ref[...] = jnp.maximum(y, 0.0).astype(o_ref.dtype)


# ------------------------------- Wrapper ----------------------------------- #

def br_forward(x, gamma, beta, *, eps=1e-3, force_two_pass=False,
               fuse_vmem_bytes=None, target_block_bytes=None,
               row_tile=None):
    """BR.forward(x):  BatchNorm3d(training-mode batch stats, eps) + ReLU.

    x:     (N, C, D, H, W)
    gamma: (C,)   (bn.weight)
    beta:  (C,)   (bn.bias)
    """
    N, C, D, H, W = x.shape
    S = D * H * W
    R = N * C
    count = float(N * S)

    tune = _default_tuning()
    if fuse_vmem_bytes is None:
        fuse_vmem_bytes = tune["fuse_vmem_bytes"]
    if target_block_bytes is None:
        target_block_bytes = tune["target_block_bytes"]
    fused_vmem_limit = tune["fused_vmem_limit"]
    stream_vmem_limit = tune["stream_vmem_limit"]

    itemsize = x.dtype.itemsize
    x_bytes = N * C * S * itemsize
    # fp32 footprint of the fused-path (N, C, S) layout incl. sublane padding.
    fused_bytes_est = N * _round_up(C, 8) * S * 4

    if (not force_two_pass) and fused_bytes_est <= fuse_vmem_bytes:
        # ---- Fused single pass: x is read from HBM exactly once. ----
        x3 = x.reshape(N, C, S)                              # free reshape
        gamma3 = gamma.reshape(1, C, 1).astype(jnp.float32)
        beta3 = beta.reshape(1, C, 1).astype(jnp.float32)
        kernel = functools.partial(_fused_bn_relu_kernel,
                                   count=count, eps=float(eps))
        y3 = pl.pallas_call(
            kernel,
            out_shape=jax.ShapeDtypeStruct((N, C, S), x.dtype),
            grid=(1,),
            in_specs=[pl.BlockSpec((N, C, S), lambda i: (0, 0, 0)),
                      pl.BlockSpec((1, C, 1), lambda i: (0, 0, 0)),
                      pl.BlockSpec((1, C, 1), lambda i: (0, 0, 0))],
            out_specs=pl.BlockSpec((N, C, S), lambda i: (0, 0, 0)),
            compiler_params=pltpu.CompilerParams(
                dimension_semantics=("arbitrary",),
                vmem_limit_bytes=fused_vmem_limit),
            cost_estimate=pl.CostEstimate(
                flops=int(8 * N * C * S), transcendentals=int(C),
                bytes_accessed=int(2 * x_bytes)),
        )(x3, gamma3, beta3)
        return y3.reshape(N, C, D, H, W)

    # ---- Two-pass streaming path (fully sublane-dense 2-D layout). ----
    x2 = x.reshape(R, S)                                     # free reshape
    if row_tile is None:
        row_tile = _pick_row_tile(R)
    tile_s = _pick_tile_s(S, row_tile, target_block_bytes)
    n_s = pl.cdiv(S, tile_s)
    n_row_blocks = pl.cdiv(R, row_tile)

    # Split the S axis into two parallel halves when there is only one row
    # block, so both TensorCores (v7x) get work during the stats pass.
    if n_row_blocks == 1 and n_s >= 2 and n_s % 2 == 0:
        n_split = 2
    else:
        n_split = 1
    n_s_inner = n_s // n_split
    mask_tail = (S % tile_s) != 0

    stats_kernel = functools.partial(
        _stats_kernel, S=S, tile_s=tile_s, n_s_inner=n_s_inner,
        mask_tail=mask_tail)

    # Pass 1: per-row partial sums / sums-of-squares, accumulated over S.
    sums, sqs = pl.pallas_call(
        stats_kernel,
        out_shape=(jax.ShapeDtypeStruct((n_split, R, 1), jnp.float32),
                   jax.ShapeDtypeStruct((n_split, R, 1), jnp.float32)),
        grid=(n_row_blocks, n_split, n_s_inner),
        in_specs=[pl.BlockSpec((row_tile, tile_s),
                               lambda r, h, s: (r, h * n_s_inner + s))],
        out_specs=(pl.BlockSpec((None, row_tile, 1), lambda r, h, s: (h, r, 0)),
                   pl.BlockSpec((None, row_tile, 1), lambda r, h, s: (h, r, 0))),
        compiler_params=pltpu.CompilerParams(
            dimension_semantics=("parallel", "parallel", "arbitrary"),
            vmem_limit_bytes=stream_vmem_limit),
        cost_estimate=pl.CostEstimate(
            flops=int(3 * R * S), transcendentals=0,
            bytes_accessed=int(x_bytes + 8 * R)),
    )(x2)

    # Tiny per-channel math done once in plain JAX (hoisted out of pass 2).
    sum_r = jnp.sum(sums, axis=0)                            # (R, 1)
    sq_r = jnp.sum(sqs, axis=0)                              # (R, 1)
    sum_c = jnp.sum(sum_r.reshape(N, C), axis=0)             # (C,)
    sq_c = jnp.sum(sq_r.reshape(N, C), axis=0)               # (C,)
    mean = sum_c * (1.0 / count)
    var = jnp.maximum(sq_c * (1.0 / count) - mean * mean, 0.0)  # biased, >= 0
    inv_std = lax.rsqrt(var + eps)
    scale_c = gamma.astype(jnp.float32) * inv_std            # (C,)
    shift_c = beta.astype(jnp.float32) - mean * scale_c      # (C,)
    scale_rows = jnp.broadcast_to(scale_c[None, :], (N, C)).reshape(R, 1)
    shift_rows = jnp.broadcast_to(shift_c[None, :], (N, C)).reshape(R, 1)

    # Pass 2: lane-dense HBM stream, fully parallel grid.
    y2 = pl.pallas_call(
        _apply_kernel,
        out_shape=jax.ShapeDtypeStruct((R, S), x.dtype),
        grid=(n_row_blocks, n_s),
        in_specs=[pl.BlockSpec((row_tile, tile_s), lambda r, s: (r, s)),
                  pl.BlockSpec((row_tile, 1), lambda r, s: (r, 0)),
                  pl.BlockSpec((row_tile, 1), lambda r, s: (r, 0))],
        out_specs=pl.BlockSpec((row_tile, tile_s), lambda r, s: (r, s)),
        compiler_params=pltpu.CompilerParams(
            dimension_semantics=("parallel", "parallel"),
            vmem_limit_bytes=stream_vmem_limit),
        cost_estimate=pl.CostEstimate(
            flops=int(3 * R * S), transcendentals=0,
            bytes_accessed=int(2 * x_bytes)),
    )(x2, scale_rows, shift_rows)

    return y2.reshape(N, C, D, H, W)


# ------------------------------ Reference ---------------------------------- #

def br_reference(x, gamma, beta, eps=1e-3):
    axes = (0, 2, 3, 4)
    mean = jnp.mean(x, axis=axes, keepdims=True)
    var = jnp.mean((x - mean) ** 2, axis=axes, keepdims=True)   # biased
    g = gamma.reshape(1, -1, 1, 1, 1)
    b = beta.reshape(1, -1, 1, 1, 1)
    y = (x - mean) * lax.rsqrt(var + eps) * g + b
    return jnp.maximum(y, 0.0)


if __name__ == "__main__":
    key = jax.random.PRNGKey(0)

    # --- Test 1: fused single-read path (small tensor, S multiple of 128). ---
    kx, kg, kb = jax.random.split(key, 3)
    N, C, D, H, W = 2, 4, 8, 8, 8                   # S = 512
    x = jax.random.normal(kx, (N, C, D, H, W), dtype=jnp.float32)
    gamma = 1.0 + 0.1 * jax.random.normal(kg, (C,), dtype=jnp.float32)
    beta = 0.1 * jax.random.normal(kb, (C,), dtype=jnp.float32)
    ref = br_reference(x, gamma, beta, eps=1e-3)
    out = jax.block_until_ready(br_forward(x, gamma, beta, eps=1e-3))
    assert out.shape == (N, C, D, H, W)
    assert jnp.allclose(out, ref, atol=1e-4, rtol=1e-4), "fused mismatch"

    # --- Test 2: two-pass path, ragged S (729), single row block ->
    #     exercises the split stats axis and the masked lane tail. ---
    kx2, kg2, kb2 = jax.random.split(jax.random.PRNGKey(1), 3)
    N2, C2, D2, H2, W2 = 1, 4, 9, 9, 9              # S = 729, R = 4
    x2 = jax.random.normal(kx2, (N2, C2, D2, H2, W2), dtype=jnp.float32)
    g2 = 1.0 + 0.1 * jax.random.normal(kg2, (C2,), dtype=jnp.float32)
    b2 = 0.1 * jax.random.normal(kb2, (C2,), dtype=jnp.float32)
    ref2 = br_reference(x2, g2, b2, eps=1e-3)
    out2 = jax.block_until_ready(
        br_forward(x2, g2, b2, eps=1e-3, force_two_pass=True))
    assert out2.shape == x2.shape
    assert jnp.allclose(out2, ref2, atol=1e-4, rtol=1e-4), "two-pass mismatch"

    # --- Test 3: two-pass path with multiple (ragged) row blocks and a
    #     ragged lane tail (row_tile=8 over R=15 rows). ---
    kx3, kg3, kb3 = jax.random.split(jax.random.PRNGKey(2), 3)
    N3, C3, D3, H3, W3 = 3, 5, 9, 9, 9              # S = 729, R = 15
    x3 = jax.random.normal(kx3, (N3, C3, D3, H3, W3), dtype=jnp.float32)
    g3 = 1.0 + 0.1 * jax.random.normal(kg3, (C3,), dtype=jnp.float32)
    b3 = 0.1 * jax.random.normal(kb3, (C3,), dtype=jnp.float32)
    ref3 = br_reference(x3, g3, b3, eps=1e-3)
    out3 = jax.block_until_ready(
        br_forward(x3, g3, b3, eps=1e-3, force_two_pass=True, row_tile=8))
    assert out3.shape == x3.shape
    assert jnp.allclose(out3, ref3, atol=1e-4, rtol=1e-4), "ragged mismatch"

    print("KERNEL_OK")
</pallas_src>

<mosaic_0001>
module attributes {stable_mosaic.version = 11 : i64} {
  func.func @_fused_bn_relu_kernel(%arg0: i32, %arg1: memref<2x4x512xf32, #tpu.memory_space<vmem>>, %arg2: memref<1x4x1xf32, #tpu.memory_space<vmem>>, %arg3: memref<1x4x1xf32, #tpu.memory_space<vmem>>, %arg4: memref<2x4x512xf32, #tpu.memory_space<vmem>>) attributes {dimension_semantics = [#tpu.dimension_semantics<arbitrary>], iteration_bounds = array<i64: 1>, scalar_prefetch = 0 : i64, scratch_operands = 0 : i64, tpu.core_type = #tpu.core_type<tc>, window_params = [{pipeline_mode = #tpu.pipeline_mode<synchronous>, transform_indices = @transform_0, window_bounds = array<i64: 2, 4, 512>}, {pipeline_mode = #tpu.pipeline_mode<synchronous>, transform_indices = @transform_1, window_bounds = array<i64: 1, 4, 1>}, {pipeline_mode = #tpu.pipeline_mode<synchronous>, transform_indices = @transform_2, window_bounds = array<i64: 1, 4, 1>}, {pipeline_mode = #tpu.pipeline_mode<synchronous>, transform_indices = @transform_3, window_bounds = array<i64: 2, 4, 512>}]} {
    %c0 = arith.constant 0 : index
    %c0_0 = arith.constant 0 : index
    %c0_1 = arith.constant 0 : index
    %0 = vector.load %arg1[%c0, %c0_0, %c0_1] : memref<2x4x512xf32, #tpu.memory_space<vmem>>, vector<2x4x512xf32>
    %cst = arith.constant dense<0.000000e+00> : vector<2x4xf32>
    %1 = vector.multi_reduction <add>, %0, %cst [2] : vector<2x4x512xf32> to vector<2x4xf32>
    %2 = vector.shape_cast %1 : vector<2x4xf32> to vector<2x4x1xf32>
    %cst_2 = arith.constant dense<0.000000e+00> : vector<4x1xf32>
    %3 = vector.multi_reduction <add>, %2, %cst_2 [0] : vector<2x4x1xf32> to vector<4x1xf32>
    %4 = vector.shape_cast %3 : vector<4x1xf32> to vector<1x4x1xf32>
    %5 = arith.mulf %0, %0 : vector<2x4x512xf32>
    %cst_3 = arith.constant dense<0.000000e+00> : vector<2x4xf32>
    %6 = vector.multi_reduction <add>, %5, %cst_3 [2] : vector<2x4x512xf32> to vector<2x4xf32>
    %7 = vector.shape_cast %6 : vector<2x4xf32> to vector<2x4x1xf32>
    %cst_4 = arith.constant dense<0.000000e+00> : vector<4x1xf32>
    %8 = vector.multi_reduction <add>, %7, %cst_4 [0] : vector<2x4x1xf32> to vector<4x1xf32>
    %9 = vector.shape_cast %8 : vector<4x1xf32> to vector<1x4x1xf32>
    %cst_5 = arith.constant 9.765625E-4 : f32
    %10 = vector.broadcast %cst_5 : f32 to vector<1x4x1xf32>
    %11 = arith.mulf %4, %10 : vector<1x4x1xf32>
    %cst_6 = arith.constant 9.765625E-4 : f32
    %12 = vector.broadcast %cst_6 : f32 to vector<1x4x1xf32>
    %13 = arith.mulf %9, %12 : vector<1x4x1xf32>
    %14 = arith.mulf %11, %11 : vector<1x4x1xf32>
    %15 = arith.subf %13, %14 : vector<1x4x1xf32>
    %cst_7 = arith.constant 0.000000e+00 : f32
    %16 = vector.broadcast %cst_7 : f32 to vector<1x4x1xf32>
    %17 = arith.maximumf %15, %16 : vector<1x4x1xf32>
    %cst_8 = arith.constant 1.000000e-03 : f32
    %18 = vector.broadcast %cst_8 : f32 to vector<1x4x1xf32>
    %19 = arith.addf %17, %18 : vector<1x4x1xf32>
    %20 = math.rsqrt %19 : vector<1x4x1xf32>
    %c0_9 = arith.constant 0 : index
    %c0_10 = arith.constant 0 : index
    %c0_11 = arith.constant 0 : index
    %21 = vector.load %arg2[%c0_9, %c0_10, %c0_11] : memref<1x4x1xf32, #tpu.memory_space<vmem>>, vector<1x4x1xf32>
    %22 = arith.mulf %21, %20 : vector<1x4x1xf32>
    %c0_12 = arith.constant 0 : index
    %c0_13 = arith.constant 0 : index
    %c0_14 = arith.constant 0 : index
    %23 = vector.load %arg3[%c0_12, %c0_13, %c0_14] : memref<1x4x1xf32, #tpu.memory_space<vmem>>, vector<1x4x1xf32>
    %24 = arith.mulf %11, %22 : vector<1x4x1xf32>
    %25 = arith.subf %23, %24 : vector<1x4x1xf32>
    %26 = vector.broadcast %22 : vector<1x4x1xf32> to vector<2x4x512xf32>
    %27 = arith.mulf %0, %26 : vector<2x4x512xf32>
    %28 = vector.broadcast %25 : vector<1x4x1xf32> to vector<2x4x512xf32>
    %29 = arith.addf %27, %28 : vector<2x4x512xf32>
    %cst_15 = arith.constant 0.000000e+00 : f32
    %30 = vector.broadcast %cst_15 : f32 to vector<2x4x512xf32>
    %31 = arith.maximumf %29, %30 : vector<2x4x512xf32>
    %c0_16 = arith.constant 0 : index
    %c0_17 = arith.constant 0 : index
    %c0_18 = arith.constant 0 : index
    %32 = vector.load %arg4[%c0_16, %c0_17, %c0_18] : memref<2x4x512xf32, #tpu.memory_space<vmem>>, vector<2x4x512xf32>
    tpu.vector_store %arg4[%c0_16, %c0_17, %c0_18], %31 {strides = array<i32>} : memref<2x4x512xf32, #tpu.memory_space<vmem>>, vector<2x4x512xf32>,
    return
  }
  func.func @transform_0(%arg0: i32) -> (i32, i32, i32) {
    %c0_i32 = arith.constant 0 : i32
    %c0_i32_0 = arith.constant 0 : i32
    %c0_i32_1 = arith.constant 0 : i32
    %c0_i32_2 = arith.constant 0 : i32
    return %c0_i32, %c0_i32_0, %c0_i32_1 : i32, i32, i32
  }
  func.func @transform_1(%arg0: i32) -> (i32, i32, i32) {
    %c0_i32 = arith.constant 0 : i32
    %c0_i32_0 = arith.constant 0 : i32
    %c0_i32_1 = arith.constant 0 : i32
    %c0_i32_2 = arith.constant 0 : i32
    return %c0_i32, %c0_i32_0, %c0_i32_1 : i32, i32, i32
  }
  func.func @transform_2(%arg0: i32) -> (i32, i32, i32) {
    %c0_i32 = arith.constant 0 : i32
    %c0_i32_0 = arith.constant 0 : i32
    %c0_i32_1 = arith.constant 0 : i32
    %c0_i32_2 = arith.constant 0 : i32
    return %c0_i32, %c0_i32_0, %c0_i32_1 : i32, i32, i32
  }
  func.func @transform_3(%arg0: i32) -> (i32, i32, i32) {
    %c0_i32 = arith.constant 0 : i32
    %c0_i32_0 = arith.constant 0 : i32
    %c0_i32_1 = arith.constant 0 : i32
    %c0_i32_2 = arith.constant 0 : i32
    return %c0_i32, %c0_i32_0, %c0_i32_1 : i32, i32, i32
  }
}

</mosaic_0001>

<bundles_post_ra>
// kernel: tpu_custom_call.1
= control target key start
LH: loop header
LB: loop body
LE: loop exit
PB: predicated region body
PF: predicated region fallthrough
CT: control target
= control target key end

     0   :  { %8 = vsyncpa [#allocation3], 0  ;;  %s349_s0 = inlined_call_operand.hbm [shape: f32[2,4,512], index: 0, kind: input, shape index: {}]   ;;  %s350_s1 = inlined_call_operand.vmem [shape: f32[1,4,1], index: 1, kind: input, shape index: {}]   ;;  %s351_s2 = inlined_call_operand.vmem [shape: f32[1,4,1], index: 2, kind: input, shape index: {}]   ;;  %s352_s3 = inlined_call_operand.hbm [shape: f32[2,4,512], index: 3, kind: output, shape index: {}]  }
   0x1   :  { %9 = vsyncpa [#allocation4], 0  ;;  %s235_s12 = smov [#allocation2]   ;;  %s187_s16 = scalar_lea.hbm %s349_s0, 512 }
   0x2   :  { %s15_s13 = sshll.u32 %s235_s12, 4  ;;  %p188_p0 = scmp.ne.s32.totalorder %s349_s0, %s187_s16  ;;  %s16_s13 = int_to_ptr.vmem [resolvable:$true] %s15_s13 }
   0x3   :  { %p191_p1 = scmp.lt.u32.totalorder %s187_s16, %s349_s0 }
   0x5   :  { %p193_p2 = pnand %p191_p1, %p188_p0 }
   0x7   :  { %196 = shalt.err (!%p193_p2)
}
   0x8   :  { %s197_s21 = scalar_lea.vmem %s16_s13, 512  ;;  %p202_p4 = scmp.lt.s32.totalorder %s16_s13, %s16_s13 }
   0x9   :  { %p198_p3 = scmp.ne.s32.totalorder %s16_s13, %s197_s21  ;;  %p203_p5 = scmp.lt.s32.totalorder %s197_s21, %s197_s21 }
   0xb   :  { %p204_p6 = por %p203_p5, %p202_p4 }
   0xd   :  { %p205_p7 = pnand %p204_p6, %p198_p3 }
   0xf   :  { %208 = shalt.err (!%p205_p7)
}
  0x10   :  { %s236_s22 = smov 256   ;;  %s237_s23 = smov 16  }
  0x11   :  { %21 = dma.hbm_to_vmem [thread:$0]  %s349_s0, 512, %s16_s13, [#allocation3], %s236_s22, %s236_s22, %s237_s23  }
  0x12   :  { %231 = dma.done.wait [#allocation3], 512  }
  0x13   :  { %232 = vsyncadd [#allocation3], 4294966784  ;;  %vm45_vm0 = vcmask 1043456   ;;  %v276_v0 = vld [vmem:[#allocation2] sm:$0xff]  ;;  %v278_v1 = vld [vmem:[#allocation2 + $0x8] sm:$0xff]  ;;  %v238_v44 = vmov 0  }
  0x14   :  { %v280_v2 = vld [vmem:[#allocation2 + $0x10] sm:$0xff]  ;;  %v37_v3 = vcombine.high %v276_v0, %v276_v0  ;;  %v38_v4 = vcombine.high %v278_v1, %v278_v1  ;;  %v46_v5 = vsel %vm45_vm0, %v276_v0, 0.0  ;;  %v288_v6 = vld [vmem:[#allocation2 + $0x18] sm:$0xff]  ;;  %v67_v7 = vmul.f32 %v276_v0, %v276_v0  ;;  %179 = vset.pattern.permute.xlu0 %v238_v44  ;;  %180 = vset.pattern.permute.xlu1 %v238_v44  ;;  %v111_v61 = vld [vmem:[%s350_s1] sm:$0xf]  ;;  %s240_s1 = smov [#allocation5]  }
  0x15   :  { %v68_v8 = vmul.f32 %v278_v1, %v278_v1  ;;  %v39_v9 = vcombine.high %v280_v2, %v280_v2  ;;  %v40_v10 = vcombine.high %v288_v6, %v288_v6  ;;  %v49_v12 = vsel %vm45_vm0, %v278_v1, 0.0 }
  0x16   :  { %v47_v11 = vsel %vm45_vm0, %v37_v3, 0.0  ;;  %v51_v13 = vsel %vm45_vm0, %v38_v4, 0.0  ;;  %v55_v14 = vsel %vm45_vm0, %v280_v2, 0.0  ;;  %v75_v16 = vcombine.high %v67_v7, %v67_v7  ;;  %v113_v3 = vld [vmem:[%s351_s2] sm:$0xf]  ;;  %s161_s2 = sshll.u32 %s240_s1, 4  ;;  %s162_s2 = int_to_ptr.vmem [resolvable:$true] %s161_s2 }
  0x17   :  { %v48_v15 = vadd.f32 %v47_v11, %v46_v5  ;;  %v76_v17 = vcombine.high %v68_v8, %v68_v8  ;;  %v83_v18 = vsel %vm45_vm0, %v67_v7, 0.0  ;;  %v86_v19 = vsel %vm45_vm0, %v68_v8, 0.0  ;;  %s209_s29 = scalar_lea.vmem %s162_s2, 512  ;;  %p214_p9 = scmp.lt.s32.totalorder %s162_s2, %s162_s2 }
  0x18   :  { %v56_v20 = vsel %vm45_vm0, %v39_v9, 0.0  ;;  %v58_v21 = vsel %vm45_vm0, %v288_v6, 0.0  ;;  %v69_v22 = vmul.f32 %v280_v2, %v280_v2  ;;  %v84_v24 = vsel %vm45_vm0, %v75_v16, 0.0  ;;  %p210_p8 = scmp.ne.s32.totalorder %s162_s2, %s209_s29  ;;  %p215_p10 = scmp.lt.s32.totalorder %s209_s29, %s209_s29 }
  0x19   :  { %v50_v23 = vadd.f32 %v49_v12, %v48_v15  ;;  %v57_v25 = vadd.f32 %v56_v20, %v55_v14  ;;  %v60_v26 = vsel %vm45_vm0, %v40_v10, 0.0  ;;  %v85_v27 = vadd.f32 %v84_v24, %v83_v18 }
  0x1a   :  { %v70_v28 = vmul.f32 %v288_v6, %v288_v6  ;;  %v77_v29 = vcombine.high %v69_v22, %v69_v22  ;;  %v92_v30 = vsel %vm45_vm0, %v69_v22, 0.0  ;;  %v88_v32 = vsel %vm45_vm0, %v76_v17, 0.0  ;;  %p216_p11 = por %p215_p10, %p214_p9 }
  0x1b   :  { %v52_v31 = vadd.f32 %v51_v13, %v50_v23  ;;  %v59_v33 = vadd.f32 %v58_v21, %v57_v25  ;;  %v87_v34 = vadd.f32 %v86_v19, %v85_v27  ;;  %v239_v7 = vmov 839922192  }
  0x1c   :  { %v78_v35 = vcombine.high %v70_v28, %v70_v28  ;;  %v93_v36 = vsel %vm45_vm0, %v77_v29, 0.0  ;;  %v95_v37 = vsel %vm45_vm0, %v70_v28, 0.0  ;;  %v121_v8 = vunpack.c.l.s4 %v239_v7  ;;  %p217_p12 = pnand %p216_p11, %p210_p8 }
  0x1d   :  { %53 = vadd.xlane.f32.xlu0 %v52_v31  ;;  %v61_v38 = vadd.f32 %v60_v26, %v59_v33  ;;  %v94_v39 = vadd.f32 %v93_v36, %v92_v30  ;;  %v89_v40 = vadd.f32 %v88_v32, %v87_v34  ;;  %v123_v9 = vlaneseq }
  0x1e   :  { %v97_v41 = vsel %vm45_vm0, %v78_v35, 0.0  ;;  %v122_v10 = vunpack.c.0.s8 %v121_v8 }
  0x1f   :  { %v96_v42 = vadd.f32 %v95_v37, %v94_v39  ;;  %90 = vadd.xlane.f32.xlu1 %v89_v40  ;;  %v124_v11 = vshrl.u32 %v123_v9, 7 }
  0x21   :  { %62 = vadd.xlane.f32.xlu0 %v61_v38  ;;  %v98_v43 = vadd.f32 %v97_v41, %v96_v42  ;;  %v125_v12 = vsub.s32 %v122_v10, %v124_v11 }
  0x23   :  { %99 = vadd.xlane.f32.xlu1 %v98_v43 }
  0xaa   :  { %v54_v45 = vpop.xlane.xlu0 %53 }
  0xab   :  { %v64_v48 = vsel %vm45_vm0, %v54_v45, 0.0 }
  0xac   :  { %v91_v46 = vpop.xlane.xlu1 %90 }
  0xad   :  { %v101_v52 = vsel %vm45_vm0, %v91_v46, 0.0 }
  0xae   :  { %v63_v47 = vpop.xlane.xlu0 %62 }
  0xaf   :  { %v65_v49 = vsel %vm45_vm0, %v63_v47, 0.0 }
  0xb0   :  { %v66_v50 = vadd.f32 %v65_v49, %v64_v48  ;;  %v100_v51 = vpop.xlane.xlu1 %99 }
  0xb1   :  { %v102_v54 = vsel %vm45_vm0, %v100_v51, 0.0 }
  0xb2   :  { %v104_v53 = vmul.f32 0.0009765625, %v66_v50  ;;  %v103_v55 = vadd.f32 %v102_v54, %v101_v52 }
  0xb4   :  { %v106_v56 = vmul.f32 %v104_v53, %v104_v53  ;;  %v105_v57 = vmul.f32 0.0009765625, %v103_v55 }
  0xb6   :  { %v107_v58 = vsub.f32 %v105_v57, %v106_v56 }
  0xb8   :  { %v108_v59 = vmax.f32 %v107_v58, 0.0 }
  0xba   :  { %v109_v60 = vadd.f32 0.001, %v108_v59 }
  0xbc   :  { %185 = vrsqrt.f32 %v109_v60 }
  0xc6   :  { %v186_v62 = vpop.eup %185 }
  0xc7   :  { %v112_v63 = vmul.f32 %v186_v62, %v111_v61 }
  0xc9   :  { %118 = vperm.xlu0 %179, %v112_v63   ;;  %v114_v4 = vmul.f32 %v112_v63, %v104_v53 }
  0xcb   :  { %v115_v5 = vsub.f32 %v113_v3, %v114_v4 }
  0xcd   :  { %134 = vperm.xlu1 %180, %v115_v5  }
 0x148   :  { %v119_v13 = vpop.permute.xlu0 %118 }
 0x149   :  { %v126_v14 = vrot.slane %v119_v13, %v125_v12 }
 0x14b   :  { %v128_v15 = vmul.f32 %v126_v14, %v276_v0  ;;  %v129_v17 = vmul.f32 %v126_v14, %v278_v1  ;;  %v130_v18 = vmul.f32 %v126_v14, %v280_v2  ;;  %v131_v19 = vmul.f32 %v126_v14, %v288_v6 }
 0x14c   :  { %v135_v16 = vpop.permute.xlu1 %134 }
 0x14d   :  { %v142_v20 = vrot.slane %v135_v16, %v125_v12 }
 0x14f   :  { %v144_v21 = vadd.f32 %v142_v20, %v128_v15  ;;  %v145_v22 = vadd.f32 %v142_v20, %v129_v17  ;;  %v146_v23 = vadd.f32 %v142_v20, %v130_v18  ;;  %v147_v24 = vadd.f32 %v142_v20, %v131_v19 }
 0x151   :  { %v148_v25 = vmax.f32 %v144_v21, 0.0  ;;  %v149_v26 = vmax.f32 %v145_v22, 0.0  ;;  %v150_v27 = vmax.f32 %v146_v23, 0.0  ;;  %v151_v28 = vmax.f32 %v147_v24, 0.0 }
 0x153   :  { %152 = vst [vmem:[#allocation5] sm:$0xff] %v148_v25  ;;  %153 = vst [vmem:[#allocation5 + $0x8] sm:$0xff] %v149_v26 }
 0x154   :  { %154 = vst [vmem:[#allocation5 + $0x10] sm:$0xff] %v150_v27  ;;  %155 = vst [vmem:[#allocation5 + $0x18] sm:$0xff] %v151_v28 }
 0x155   :  { %220 = shalt.err (!%p217_p12)
}
 0x156   :  { %s221_s5 = scalar_lea.hbm %s352_s3, 512 }
 0x157   :  { %p222_p13 = scmp.ne.s32.totalorder %s352_s3, %s221_s5  ;;  %p225_p0 = scmp.lt.u32.totalorder %s221_s5, %s352_s3 }
 0x159   :  { %p227_p1 = pnand %p225_p0, %p222_p13 }
 0x15b   :  { %230 = shalt.err (!%p227_p1)
}
 0x15c   :  { %167 = dma.vmem_to_hbm [thread:$0]  %s162_s2, 512, %s352_s3, [#allocation4], %s236_s22, %s236_s22, %s237_s23  }
 0x15d   :  { %233 = dma.done.wait [#allocation4], 512  }
 0x15e   :  { %234 = vsyncadd [#allocation4], 4294966784 }
 0x15f   :  { %171 = vsyncpa [#allocation3], 1 }
 0x160   :  { %172 = vsyncpa [#allocation4], 1 }

</bundles_post_ra>
